<compile_context>
chip_gen: v6e
topology: v6e:2x2x1
jax: 0.10.0
libtpu: 0.0.40
codegen_flags: <defaults>
</compile_context>

<pallas_src>
import jax
import jax.numpy as jnp
from jax.experimental import pallas as pl
from jax.experimental.pallas import tpu as pltpu


# Max packed row count R = G*C.  Conservative (v5e f32) cap that keeps the
# kron(I_G, W) replication hidden under the HBM DMA on every generation.
_R_CAP = 64


def _conv1x1_kernel(w_ref, x_ref, o_ref):
    # w_ref: (R, R) f32 block-diagonal weight; x_ref: (R, tile) activations at their
    # HBM dtype; o_ref: (R, tile) at the compute/output dtype.
    # Channel mixing == MXU matmul with f32 accumulation; the only dtype cast is on
    # the output store (no wrapper-side astype / extra HBM pass).  The kernel is
    # DMA-bound (K = R <= 64), so running the MXU at f32 input precision is free.
    o_ref[...] = jnp.dot(
        w_ref[...], x_ref[...], preferred_element_type=jnp.float32
    ).astype(o_ref.dtype)


def _vmem_budgets():
    """(tile_budget, vmem_limit) derived from the chip's VMEM capacity.

    128 MiB parts (v5e/v6e): ~42 MiB tile budget / 96 MiB scoped limit.
    64 MiB parts (v7x) or unknown: ~21 MiB tile budget / 48 MiB scoped limit.
    """
    try:
        cap = int(pltpu.get_tpu_info().vmem_capacity_bytes)
    except Exception:
        cap = 64 * 1024 * 1024  # conservative, v7x-safe fallback
    tile_budget = max(16 << 20, cap // 3)
    vmem_limit = min(max(48 << 20, (cap * 3) // 4), cap - (8 << 20))
    return tile_budget, vmem_limit


def _divisors(n):
    out = set()
    i = 1
    while i * i <= n:
        if n % i == 0:
            out.add(i)
            out.add(n // i)
        i += 1
    return out


def _choose_group(n, c, r_cap):
    """Largest divisor G of n with R = G*c a multiple of 8 and R <= r_cap (preferred);
    otherwise the largest divisor with R <= r_cap; otherwise 1."""
    best_g, best_key = 1, ((c % 8) == 0, 1)
    for g in sorted(_divisors(n)):
        if g == 1:
            continue
        r = g * c
        if r > r_cap:
            continue
        key = ((r % 8) == 0, g)
        if key > best_key:
            best_g, best_key = g, key
    return best_g


def _choose_lane_tile(hw, cap_lanes):
    """Lane-tile width.  Prefer a divisor of hw that is a multiple of 256 (or 128)
    and fits the VMEM cap; else the largest multiple of 128 <= cap and let a cdiv
    grid handle the partial last block (never pull an oversized full row into VMEM);
    tiny rows (hw <= 128) take the full dim."""
    if hw <= 128:
        return hw
    cap = max(128, min(cap_lanes, hw))
    aligned = [d for d in _divisors(hw) if d % 128 == 0 and d <= cap]
    if aligned:
        a256 = [d for d in aligned if d % 256 == 0]
        return max(a256) if a256 else max(aligned)
    return (cap // 128) * 128


def invertible_conv_forward(x, w, *, compute_dtype=None):
    """GLOW invertible 1x1 conv forward. x: (N, C, H, W), w: (C, C) -> (y, log_det).

    compute_dtype only changes the output/activation store dtype (e.g. jnp.bfloat16
    to halve write traffic on v6e/v7x); the weight is used in f32 so forward and
    log_det stay exactly consistent.
    """
    N, C, H, W = x.shape
    HW = H * W
    cdtype = x.dtype if compute_dtype is None else jnp.dtype(compute_dtype)
    x_is = jnp.dtype(x.dtype).itemsize
    o_is = jnp.dtype(cdtype).itemsize

    tile_budget, vmem_limit = _vmem_budgets()

    # Pack G batch elements per block so the sublane (row) dim R = G*C is a multiple
    # of 8 (dense vregs, unmasked stores, fat DMAs, fewer grid steps along N).
    G = _choose_group(N, C, _R_CAP)
    R = G * C
    NB = N // G
    # TODO(synk): shapes where no divisor of N aligns R to 8 (e.g. C=3 with odd N)
    # fall back to a full-dim, sublane-sparse block; padding N/C would recover the
    # dense-vreg path at the cost of an extra HBM pad pass.

    # Block-diagonal weight kron(I_G, W), kept in f32 (its bytes are negligible).
    w32 = w.astype(jnp.float32)
    w_blk = w32 if G == 1 else jnp.kron(jnp.eye(G, dtype=jnp.float32), w32)

    # Pure reshape of the contiguous NCHW input — NO dtype cast here (a wrapper-side
    # astype would cost a full extra HBM read+write pass before the kernel starts).
    x3 = x.reshape(NB, R, HW)

    # Lane tile: double-buffered in/out tiles plus the resident weight fit the budget.
    w_bytes = 2 * 4 * R * R
    per_lane = 2 * R * (x_is + o_is)
    cap_lanes = max(128, (tile_budget - w_bytes) // per_lane)
    tile = _choose_lane_tile(HW, cap_lanes)
    n_lane = -(-HW // tile)

    # v7x has 2 TensorCores: guarantee >= 2 grid points so both get sharded work
    # (harmless per-step overhead on single-TC v5e/v6e).
    if NB * n_lane < 2 and HW >= 256:
        half = (HW // 2) // 128 * 128
        if 128 <= half < tile:
            tile = half
            n_lane = -(-HW // tile)

    grid = (NB, n_lane)

    cost = pl.CostEstimate(
        flops=2 * NB * R * R * HW,
        transcendentals=0,
        bytes_accessed=(x_is + o_is) * N * C * HW + 4 * R * R,
    )

    y3 = pl.pallas_call(
        _conv1x1_kernel,
        out_shape=jax.ShapeDtypeStruct((NB, R, HW), cdtype),
        grid_spec=pltpu.PrefetchScalarGridSpec(
            num_scalar_prefetch=0,
            grid=grid,
            in_specs=[
                # Weight block stays VMEM-resident across the whole grid.
                pl.BlockSpec((R, R), lambda n, t: (0, 0)),
                # Squeeze the batch-block dim: the kernel sees a clean (R, tile) tile.
                pl.BlockSpec((pl.Squeezed(), R, tile), lambda n, t: (n, 0, t)),
            ],
            out_specs=pl.BlockSpec((pl.Squeezed(), R, tile), lambda n, t: (n, 0, t)),
        ),
        compiler_params=pltpu.CompilerParams(
            dimension_semantics=("parallel", "parallel"),
            vmem_limit_bytes=vmem_limit,
        ),
        cost_estimate=cost,
    )(w_blk, x3)

    y = y3.reshape(N, C, H, W)

    # TODO(synk): slogdet of the tiny CxC weight (LU decomposition) has no clean
    # Pallas hot path; computed in plain JAX on the f32 matrix.
    log_det = (H * W) * jnp.linalg.slogdet(w.astype(jnp.float32))[1]
    return y, log_det


def _orthogonal_init(key, channels):
    # Deterministic orthogonal init (mirrors torch.nn.init.orthogonal_).
    a = jax.random.normal(key, (channels, channels), dtype=jnp.float32)
    q, r = jnp.linalg.qr(a)
    q = q * jnp.sign(jnp.diag(r))[None, :]  # sign fix for a unique decomposition
    return q


if __name__ == "__main__":
    key = jax.random.PRNGKey(0)
    k_w, k_x = jax.random.split(key)

    N, C, H, W = 2, 4, 16, 16
    w = _orthogonal_init(k_w, C)
    x = jax.random.normal(k_x, (N, C, H, W), dtype=jnp.float32)

    # Default f32 path (matches the PyTorch module's precision).
    y, log_det = invertible_conv_forward(x, w)
    y = jax.block_until_ready(y)
    log_det = jax.block_until_ready(log_det)

    # Reference check (plain JAX equivalent of F.conv2d with a 1x1 kernel).
    y_ref = jnp.einsum("oc,nchw->nohw", w, x)
    log_det_ref = (H * W) * jnp.linalg.slogdet(w)[1]

    assert y.shape == (N, C, H, W)
    assert jnp.allclose(y, y_ref, atol=1e-5, rtol=1e-5)
    assert jnp.allclose(log_det, log_det_ref, atol=1e-5, rtol=1e-5)

    # bf16 output-traffic-halving path: input stays f32 in HBM, f32 MXU accumulation,
    # only the output store is bf16 — so the error is a single rounding step.
    y_bf16, log_det_bf16 = invertible_conv_forward(x, w, compute_dtype=jnp.bfloat16)
    y_bf16 = jax.block_until_ready(y_bf16)
    assert y_bf16.shape == (N, C, H, W)
    assert float(jnp.max(jnp.abs(y_bf16.astype(jnp.float32) - y_ref))) < 0.1
    assert jnp.allclose(log_det_bf16, log_det_ref, atol=1e-5, rtol=1e-5)

    print("KERNEL_OK")
</pallas_src>

<mosaic_0001>
module attributes {stable_mosaic.version = 11 : i64} {
  func.func @_conv1x1_kernel(%arg0: i32, %arg1: i32, %arg2: memref<8x8xf32, #tpu.memory_space<vmem>>, %arg3: memref<1x8x128xf32, #tpu.memory_space<vmem>>, %arg4: memref<1x8x128xf32, #tpu.memory_space<vmem>>) attributes {dimension_semantics = [#tpu.dimension_semantics<parallel>, #tpu.dimension_semantics<parallel>], iteration_bounds = array<i64: 1, 2>, scalar_prefetch = 0 : i64, scratch_operands = 0 : i64, tpu.core_type = #tpu.core_type<tc>, window_params = [{pipeline_mode = #tpu.pipeline_mode<synchronous>, transform_indices = @transform_0, window_bounds = array<i64: 8, 8>}, {transform_indices = @transform_1, window_bounds = array<i64: 1, 8, 128>}, {transform_indices = @transform_2, window_bounds = array<i64: 1, 8, 128>}]} {
    %c0 = arith.constant 0 : index
    %c0_0 = arith.constant 0 : index
    %0 = vector.load %arg2[%c0, %c0_0] : memref<8x8xf32, #tpu.memory_space<vmem>>, vector<8x8xf32>
    %c0_1 = arith.constant 0 : index
    %c0_2 = arith.constant 0 : index
    %c0_3 = arith.constant 0 : index
    %1 = vector.load %arg3[%c0_1, %c0_2, %c0_3] : memref<1x8x128xf32, #tpu.memory_space<vmem>>, vector<1x8x128xf32>
    %2 = vector.shape_cast %1 : vector<1x8x128xf32> to vector<8x128xf32>
    %cst = arith.constant dense<0.000000e+00> : vector<8x128xf32>
    %3 = tpu.matmul %0, %2, %cst {dimension_numbers = #tpu.dot_dimension_numbers<[1], [0], [0], [1], [0, 0, 1, 1], [], []>} : vector<8x8xf32>, vector<8x128xf32>, vector<8x128xf32> -> vector<8x128xf32>
    %c0_4 = arith.constant 0 : index
    %c0_5 = arith.constant 0 : index
    %c0_6 = arith.constant 0 : index
    %4 = vector.load %arg4[%c0_4, %c0_5, %c0_6] : memref<1x8x128xf32, #tpu.memory_space<vmem>>, vector<1x8x128xf32>
    %5 = vector.shape_cast %4 : vector<1x8x128xf32> to vector<8x128xf32>
    %6 = vector.shape_cast %3 : vector<8x128xf32> to vector<1x8x128xf32>
    tpu.vector_store %arg4[%c0_4, %c0_5, %c0_6], %6 {strides = array<i32>} : memref<1x8x128xf32, #tpu.memory_space<vmem>>, vector<1x8x128xf32>,
    return
  }
  func.func @transform_0(%arg0: i32, %arg1: i32) -> (i32, i32) {
    %c0_i32 = arith.constant 0 : i32
    %c0_i32_0 = arith.constant 0 : i32
    %c0_i32_1 = arith.constant 0 : i32
    return %c0_i32, %c0_i32_0 : i32, i32
  }
  func.func @transform_1(%arg0: i32, %arg1: i32) -> (i32, i32, i32) {
    %c0_i32 = arith.constant 0 : i32
    %c0_i32_0 = arith.constant 0 : i32
    return %arg0, %c0_i32, %arg1 : i32, i32, i32
  }
  func.func @transform_2(%arg0: i32, %arg1: i32) -> (i32, i32, i32) {
    %c0_i32 = arith.constant 0 : i32
    %c0_i32_0 = arith.constant 0 : i32
    return %arg0, %c0_i32, %arg1 : i32, i32, i32
  }
}

</mosaic_0001>

<bundles_post_ra>
// kernel: tpu_custom_call.1
= control target key start
LH: loop header
LB: loop body
LE: loop exit
PB: predicated region body
PF: predicated region fallthrough
CT: control target
= control target key end

     0   :  { %7 = vsyncpa [#allocation3], 0  ;;  %s808_s0 = inlined_call_operand.hbm [shape: f32[8,8], index: 0, kind: input, shape index: {}]   ;;  %s809_s1 = inlined_call_operand.hbm [shape: f32[1,8,256], index: 1, kind: input, shape index: {}]   ;;  %s810_s2 = inlined_call_operand.hbm [shape: f32[1,8,256], index: 2, kind: output, shape index: {}]  }
   0x1   :  { %8 = vsyncpa [#allocation6], 0 }
   0x2   :  { %10 = vsyncpa [#allocation6 + $0x1], 0 }
   0x3   :  { %11 = vsyncpa [#allocation4], 0 }
   0x4   :  { %13 = vsyncpa [#allocation4 + $0x1], 0  ;;  %s635_s9 = smov 0   ;;  %s637_s10 = smov 0  }
   0x5   :  { %s639_s11 = smov 0   ;;  %s641_s12 = smov 0  }
   0x6   :  { %s643_s13 = smov 0   ;;  %s645_s14 = smov 0  }
   0x7 LB: > { %s377_s15 = sadd.s32 4294967295, %s613_s14   ;;  %s378_s16 = sadd.s32 4294967294, %s613_s14   ;;  %s613_s14 = sphi %s645_s14, %s19_s14   ;;  %s609_s13 = sphi %s643_s13, %s827_s13   ;;  %s605_s12 = sphi %s641_s12, %s826_s12   ;;  %s601_s11 = sphi %s639_s11, %s825_s11   ;;  %s597_s10 = sphi %s637_s10, %s824_s10   ;;  %s593_s9 = sphi %s635_s9, %s823_s9  }
   0x8   : > { %p74_p0 = scmp.ne.s32.totalorder %s597_s10, %s593_s9  ;;  %p669_p1 = scmp.eq.s32.totalorder %s377_s15, 0 }
   0x9   : > { %p673_p2 = scmp.eq.s32.totalorder %s377_s15, 1  ;;  %p106_p3 = scmp.eq.s32.totalorder %s378_s16, 1 }
   0xa   : > { %p679_p4 = por %p669_p1, %p74_p0  ;;  %p379_p5 = scmp.ge.s32.totalorder %s613_s14, 1 }
   0xb   : > { %p684_p6 = por %p106_p3, %p74_p0  ;;  %p113_p7 = scmp.lt.s32.totalorder %s613_s14, 3 }
   0xc   : > { %s814_s19 = scalar_select %p679_p4, 1, 0 }
   0xd   : > { %s815_s20 = scalar_select %p684_p6, 1, 0 }
   0xe   : > { %p689_p8 = pnand %p379_p5, %p113_p7  ;;  %s615_s22 = smov [#allocation2]  }
   0xf   : > { %s126_s23 = sshll.u32 %s615_s22, 4  ;;  %s28_s25 = sadd.s32 1, %s609_s13  ;;  %s127_s23 = int_to_ptr.vmem [resolvable:$true] %s126_s23 }
  0x10   : > { %p408_p10 = pneg %p689_p8  ;;  %s61_s26 = sadd.s32 1, %s601_s11 }
  0x11   : > { %p29_p12 = scmp.ge.s32.totalorder %s28_s25, 2  ;;  %s486_s27 = scalar_lea.vmem %s127_s23, 128 }
  0x12   : > { %p698_p11 = pnand %p408_p10, %p669_p1  ;;  %p487_p0 = scmp.ne.s32.totalorder %s127_s23, %s486_s27 }
  0x13   : > { %p494_p7 = scmp.lt.s32.totalorder %s127_s23, %s127_s23  ;;  %p495_p6 = scmp.lt.s32.totalorder %s486_s27, %s486_s27 }
  0x14   : > { %p477_p13 = pneg %p698_p11 }
  0x15   : > { %p496_p9 = por %p495_p6, %p494_p7 }
  0x16   : > { %p489_p3 = pnand %p487_p0, %p477_p13 }
  0x18   : > { %p490_p5 = pneg %p489_p3 }
  0x1a   : > { %p497_p4 = pnand %p496_p9, %p490_p5 }
  0x1c   : > { %500 = shalt.err (!%p497_p4)
}
  0x1d   : > { %411 = dma.hbm_to_vmem [thread:$0]  (!%p698_p11), %s808_s0, 128, %s127_s23, [#allocation3]  }
  0x1e   : > { %s829_s25 = smov (%p29_p12, %s28_s25), 0  ;;  %p68_p6 = scmp.ne.s32.totalorder %s601_s11, %s597_s10 }
  0x1f   : > { %p69_p4 = scmp.eq.s32.totalorder %s613_s14, 0  ;;  %s57_s30 = ssub.s32 %s609_s13, %s829_s25 }
  0x20   : > { %p421_p9 = scmp.lt.s32.totalorder %s613_s14, 2  ;;  %p59_p10 = scmp.eq.s32.totalorder %s57_s30, 0 }
  0x21   : > { %p70_p13 = por %p69_p4, %p68_p6  ;;  %p721_p0 = por %p673_p2, %p68_p6 }
  0x22   : > { %s137_s4 = sand.u32 1, %s601_s11   ;;  %s383_s7 = sshll.u32 %s609_s13, 7 }
  0x23   : > { %s727_s5 = scalar_select %p59_p10, %s601_s11, %s61_s26  }
  0x24   : > { %s382_s6 = sshll.u32 %s137_s4, 3  ;;  %s148_s16 = scalar_lea.hbm %s809_s1, %s383_s7 }
  0x25   : > { %s141_s22 = scalar_lea.vmem [#allocation5], %s382_s6  ;;  %p733_p11 = pnand %p421_p9, %p70_p13 }
  0x26   : > { %s150_s23 = sshll.u32 %s141_s22, 4  ;;  %s138_s18 = scalar_lea.sflag [#allocation6], %s137_s4  ;;  %s151_s23 = int_to_ptr.vmem [resolvable:$true] %s150_s23 }
  0x27   : > { %p503_p2 = pneg %p733_p11  ;;  %s514_s27 = scalar_lea.vmem %s151_s23, 128 }
  0x28   : > { %p515_p12 = scmp.ne.s32.totalorder %s151_s23, %s514_s27  ;;  %s616_s26 = smov [#allocation5]  }
  0x29   : > { %s519_s28 = sshll.u32 %s616_s26, 4  ;;  %s520_s28 = int_to_ptr.vmem [resolvable:$false] %s519_s28 }
  0x2a   : > { %p517_p3 = pnand %p515_p12, %p503_p2  ;;  %s521_s29 = scalar_lea.vmem %s520_s28, 256 }
  0x2b   : > { %p522_p7 = scmp.lt.s32.totalorder %s151_s23, %s520_s28  ;;  %p523_p6 = scmp.lt.s32.totalorder %s521_s29, %s514_s27 }
  0x2c   : > { %p518_p5 = pneg %p517_p3 }
  0x2d   : > { %p524_p4 = por %p523_p6, %p522_p7 }
  0x2f   : > { %p525_p10 = pnand %p524_p4, %p518_p5 }
  0x31   : > { %528 = shalt.err (!%p525_p10)
}
  0x32   : > { %415 = dma.hbm_to_vmem [thread:$0]  (!%p733_p11), %s148_s16, 128, %s151_s23, %s138_s18  }
  0x33   : > { %159 = sbr.rel (%p689_p8) target bundleno = 271 (0x10f), region = 28 }
  0x38   : > { %580 = dma.done.wait (%p669_p1), [#allocation3], 128  }
  0x39   : > { %582 = vsyncadd (%p669_p1), [#allocation3], 4294967168  ;;  %s748_s30 = sand.u32 1, %s597_s10   ;;  %p820_p9 = scmp.ne.s32.totalorder %s814_s19, 0 }
  0x3a   : > { %s386_s4 = sshll.u32 %s748_s30, 3  ;;  %s166_s6 = scalar_lea.sflag [#allocation6], %s748_s30 }
  0x3b   : > { %s169_s7 = scalar_lea.vmem [#allocation5], %s386_s4 }
  0x3c   : > { %584 = dma.done.wait (%p820_p9), %s166_s6, 128  }
  0x3d   : > { %586 = vsyncadd (%p820_p9), %s166_s6, 4294967168  ;;  %v617_v0 = vmov 0.0   ;;  %vm618_vm0 = vmmov 0   ;;  %vm192_vm1 = vcmask 64512   ;;  %v191_v1 = vld [vmem:[%s169_s7] sm:$0xff]  ;;  %v190_v2 = vld [vmem:[#allocation2] sm:$0xff] }
  0x3e   : > { %395 = vmatprep.subr.mxu0 %v617_v0  ;;  %397 = vmatprep.mubr.msk.f32.mxu0 %vm618_vm0, %v617_v0  ;;  %s189_s17 = scalar_lea.vmem [#allocation7], %s386_s4  ;;  %s390_s8 = sshll.u32 %s605_s12, 7 }
  0x3f   : > { %396 = vmatpush3.msra.mxu0 %v191_v1  ;;  %s283_s21 = sshll.u32 %s189_s17, 4  ;;  %s762_s16 = scalar_lea.hbm %s810_s2, %s390_s8  ;;  %s757_s21 = int_to_ptr.vmem [resolvable:$true] %s283_s21 }
  0x40   : > { %398 = vmatmul.mubr.msk.f32.vlgmr.msra.gmra.mxu0 %vm192_vm1, %v190_v2  ;;  %s268_s22 = scalar_lea.sflag [#allocation4], %s748_s30  ;;  %s529_s23 = scalar_lea.vmem %s757_s21, 128 }
  0x41   : > { %p530_p1 = scmp.ne.s32.totalorder %s757_s21, %s529_s23  ;;  %s619_s12 = smov [#allocation7]  }
  0x42   : > { %s533_s24 = sshll.u32 %s619_s12, 4  ;;  %s534_s24 = int_to_ptr.vmem [resolvable:$false] %s533_s24 }
  0x43   : > { %p531_p8 = pnand %p530_p1, %p721_p0  ;;  %s535_s18 = scalar_lea.vmem %s534_s24, 256 }
  0x44   : > { %p536_p11 = scmp.lt.s32.totalorder %s757_s21, %s534_s24  ;;  %p537_p2 = scmp.lt.s32.totalorder %s535_s18, %s529_s23 }
  0x45   : > { %p532_p13 = pneg %p531_p8 }
  0x46   : > { %p538_p12 = por %p537_p2, %p536_p11 }
  0x48   : > { %p539_p3 = pnand %p538_p12, %p532_p13 }
 0x100   : > { %v262_v3 = vpop.f32.mrf.mxu0 }
 0x101   : > { %266 = vst [vmem:[%s189_s17] sm:$0xff] %v262_v3 }
 0x102   : > { %v399_v4 = vpop.f32.mrf.mxu0 }
 0x103   : > { %542 = shalt.err (!%p539_p3)
}
 0x104   : > { %s543_s27 = scalar_lea.hbm %s762_s16, 128  ;;  %s547_s29 = scalar_lea.hbm %s810_s2, 256 }
 0x105   : > { %p544_p5 = scmp.ne.s32.totalorder %s762_s16, %s543_s27  ;;  %p548_p4 = scmp.lt.s32.totalorder %s762_s16, %s810_s2 }
 0x106   : > { %p549_p10 = scmp.lt.s32.totalorder %s547_s29, %s543_s27 }
 0x107   : > { %p545_p7 = pnand %p544_p5, %p721_p0 }
 0x108   : > { %p550_p9 = por %p549_p10, %p548_p4 }
 0x109   : > { %p546_p6 = pneg %p545_p7 }
 0x10b   : > { %p551_p1 = pnand %p550_p9, %p546_p6 }
 0x10d   : > { %554 = shalt.err (!%p551_p1)
}
 0x10e   : > { %406 = dma.vmem_to_hbm [thread:$0]  (%p721_p0), %s757_s21, 128, %s762_s16, %s268_s22  }
 0x10f PF: > { %s295_s6 = sand.u32 1, %s593_s9   ;;  %p821_p8 = scmp.ne.s32.totalorder %s815_s20, 0 }
 0x110   : > { %p822_p13 = scmp.ge.s32.totalorder %s613_s14, 2  ;;  %s296_s7 = scalar_lea.sflag [#allocation4], %s295_s6 }
 0x112   : > { %p417_p11 = pnand %p822_p13, %p821_p8 }
 0x114   : > { %p418_p2 = pneg %p417_p11 }
 0x116   : > { %588 = dma.done.wait (%p418_p2), %s296_s7, 128  }
 0x117   : > { %590 = vsyncadd (%p418_p2), %s296_s7, 4294967168  ;;  %s19_s14 = sadd.s32 1, %s613_s14   ;;  %s823_s9 = smov %s597_s10 }
 0x118   : > { %p16_p12 = scmp.ge.s32.totalorder %s19_s14, 4   ;;  %s824_s10 = smov %s601_s11 }
 0x119   : > { %s825_s11 = smov %s727_s5  ;;  %s826_s12 = smov %s609_s13 }
 0x11a   : > { %s827_s13 = smov %s829_s25  ;;  %18 = sbr.rel (!%p16_p12) target bundleno = 7 (0x7), region = 78 }
 0x11f   :  { %301 = vsyncpa [#allocation3], 1 }
 0x120   :  { %303 = vsyncpa [#allocation3 + $0x1], 1 }
 0x121   :  { %304 = vsyncpa [#allocation6], 1 }
 0x122   :  { %306 = vsyncpa [#allocation6 + $0x1], 1 }
 0x123   :  { %307 = vsyncpa [#allocation4], 1 }
 0x124   :  { %309 = vsyncpa [#allocation4 + $0x1], 1 }

</bundles_post_ra>
